<compile_context>
chip_gen: v7x
topology: tpu7x:2x2x1
jax: 0.10.0
libtpu: 0.0.40
codegen_flags: <defaults>
</compile_context>

<pallas_src>
import jax
import jax.numpy as jnp
from jax import lax
from jax.experimental import pallas as pl
from jax.experimental.pallas import tpu as pltpu


# ---------------- fused projection + bilinear-logits kernel (per batch) ----------
def bc_kernel(v_ref, q_ref, wv_ref, bv_ref, wq_ref, bq_ref, hm_ref, hb_ref,
              out_ref):
    """One batch element per grid step.

    v_ref : (1, V, F)   q_ref : (1, Q, H)
    wv_ref: (F, K)      bv_ref: (1, K)
    wq_ref: (H, K)      bq_ref: (1, K)
    hm_ref: (G, K)      hb_ref: (G, 1)
    out_ref: (1, G, V*Q)   (lane-dense over V*Q)
    """
    _, V, _ = v_ref.shape
    _, Q, _ = q_ref.shape

    # ReLU(x @ W + b) projections; f32 accumulation on the MXU.
    v_ = jnp.maximum(
        jnp.dot(v_ref[0], wv_ref[...], preferred_element_type=jnp.float32)
        + bv_ref[...], 0.0)                                    # (V, K) f32
    q_ = jnp.maximum(
        jnp.dot(q_ref[0], wq_ref[...], preferred_element_type=jnp.float32)
        + bq_ref[...], 0.0)                                    # (Q, K) f32

    # m[i*Q + j, k] = v_[i, k] * q_[j, k]; reshape only merges leading dims (K last).
    K = v_.shape[-1]
    m = (v_[:, None, :] * q_[None, :, :]).reshape(V * Q, K)    # (V*Q, K) f32

    # Fold the glimpse axis into a single MXU matmul with a lane-dense result:
    #   logits[g, i*Q + j] = sum_k h_mat[g, k] * m[i*Q + j, k]
    logits = lax.dot_general(
        hm_ref[...], m.astype(hm_ref.dtype),
        (((1,), (1,)), ((), ())),
        preferred_element_type=jnp.float32)                    # (G, V*Q) f32

    out_ref[0] = logits + hb_ref[...]                          # per-glimpse bias


# ---------------- wrapper -------------------------------------------------------
def bc_forward(v, q, params, *, compute_dtype=jnp.float32):
    """Returns logits of shape (B, G, V, Q) in float32."""
    B, V, F = v.shape
    Bq, Q, H = q.shape
    assert Bq == B
    K = params["w_v"].shape[1]
    G = params["h_mat"].shape[0]

    cdt = compute_dtype
    vx = v.astype(cdt)
    qx = q.astype(cdt)
    wv = params["w_v"].astype(cdt)
    wq = params["w_q"].astype(cdt)
    bv = params["b_v"].reshape(1, K).astype(jnp.float32)
    bq = params["b_q"].reshape(1, K).astype(jnp.float32)
    hm = params["h_mat"].astype(cdt)
    hb = params["h_bias"].reshape(G, 1).astype(jnp.float32)

    out = pl.pallas_call(
        bc_kernel,
        grid=(B,),
        in_specs=[
            pl.BlockSpec((1, V, F), lambda b: (b, 0, 0)),   # v  : per-batch tile
            pl.BlockSpec((1, Q, H), lambda b: (b, 0, 0)),   # q  : per-batch tile
            pl.BlockSpec((F, K), lambda b: (0, 0)),         # W_v: VMEM-resident
            pl.BlockSpec((1, K), lambda b: (0, 0)),         # b_v
            pl.BlockSpec((H, K), lambda b: (0, 0)),         # W_q: VMEM-resident
            pl.BlockSpec((1, K), lambda b: (0, 0)),         # b_q
            pl.BlockSpec((G, K), lambda b: (0, 0)),         # h_mat
            pl.BlockSpec((G, 1), lambda b: (0, 0)),         # h_bias
        ],
        out_specs=pl.BlockSpec((1, G, V * Q), lambda b: (b, 0, 0)),
        out_shape=jax.ShapeDtypeStruct((B, G, V * Q), jnp.float32),
        compiler_params=pltpu.CompilerParams(
            dimension_semantics=("parallel",)),
    )(vx, qx, wv, bv, wq, bq, hm, hb)

    # Pure reshape (no data movement): (B, G, V*Q) -> (B, G, V, Q).
    return out.reshape(B, G, V, Q)


# ---------------- pure-JAX reference (BC.forward, eval mode) ---------------------
def reference(v, q, params):
    v_ = jnp.maximum(v @ params["w_v"] + params["b_v"], 0.0)
    q_ = jnp.maximum(q @ params["w_q"] + params["b_q"], 0.0)
    logits = jnp.einsum("gk,bvk,bqk->bgvq", params["h_mat"], v_, q_)
    return logits + params["h_bias"][None, :, None, None]


if __name__ == "__main__":
    key = jax.random.PRNGKey(0)
    B, V, Q = 2, 16, 8
    IMG_FEAT, HIDDEN, K_TIMES, GLIMPSE = 64, 64, 2, 4
    K = K_TIMES * HIDDEN  # 128

    ks = jax.random.split(key, 8)
    v = jax.random.normal(ks[0], (B, V, IMG_FEAT), jnp.float32)
    q = jax.random.normal(ks[1], (B, Q, HIDDEN), jnp.float32)

    params = {
        "w_v": 0.05 * jax.random.normal(ks[2], (IMG_FEAT, K), jnp.float32),
        "b_v": 0.05 * jax.random.normal(ks[3], (K,), jnp.float32),
        "w_q": 0.05 * jax.random.normal(ks[4], (HIDDEN, K), jnp.float32),
        "b_q": 0.05 * jax.random.normal(ks[5], (K,), jnp.float32),
        "h_mat": jax.random.normal(ks[6], (GLIMPSE, K), jnp.float32),
        "h_bias": jax.random.normal(ks[7], (GLIMPSE,), jnp.float32),
    }

    # f32 path: tight check vs. reference.
    logits = bc_forward(v, q, params)
    jax.block_until_ready(logits)
    ref = reference(v, q, params)
    assert logits.shape == (B, GLIMPSE, V, Q)
    assert bool(jnp.allclose(logits, ref, atol=2e-3, rtol=2e-3)), (
        "f32 mismatch: max abs err = "
        + str(float(jnp.max(jnp.abs(logits - ref)))))

    # bf16 compute path (f32 accumulation): loose sanity check.
    logits_bf16 = bc_forward(v, q, params, compute_dtype=jnp.bfloat16)
    jax.block_until_ready(logits_bf16)
    max_ref = float(jnp.max(jnp.abs(ref)))
    assert bool(jnp.max(jnp.abs(logits_bf16 - ref)) < 0.1 * (1.0 + max_ref))

    print("KERNEL_OK")
</pallas_src>

<mosaic_0001>
module attributes {stable_mosaic.version = 11 : i64} {
  func.func @bc_kernel(%arg0: i32, %arg1: memref<1x16x64xf32, #tpu.memory_space<vmem>>, %arg2: memref<1x8x64xf32, #tpu.memory_space<vmem>>, %arg3: memref<64x128xf32, #tpu.memory_space<vmem>>, %arg4: memref<1x128xf32, #tpu.memory_space<vmem>>, %arg5: memref<64x128xf32, #tpu.memory_space<vmem>>, %arg6: memref<1x128xf32, #tpu.memory_space<vmem>>, %arg7: memref<4x128xf32, #tpu.memory_space<vmem>>, %arg8: memref<4x1xf32, #tpu.memory_space<vmem>>, %arg9: memref<1x4x128xf32, #tpu.memory_space<vmem>>) attributes {dimension_semantics = [#tpu.dimension_semantics<parallel>], iteration_bounds = array<i64: 2>, scalar_prefetch = 0 : i64, scratch_operands = 0 : i64, tpu.core_type = #tpu.core_type<tc>, window_params = [{transform_indices = @transform_0, window_bounds = array<i64: 1, 16, 64>}, {transform_indices = @transform_1, window_bounds = array<i64: 1, 8, 64>}, {pipeline_mode = #tpu.pipeline_mode<synchronous>, transform_indices = @transform_2, window_bounds = array<i64: 64, 128>}, {pipeline_mode = #tpu.pipeline_mode<synchronous>, transform_indices = @transform_3, window_bounds = array<i64: 1, 128>}, {pipeline_mode = #tpu.pipeline_mode<synchronous>, transform_indices = @transform_4, window_bounds = array<i64: 64, 128>}, {pipeline_mode = #tpu.pipeline_mode<synchronous>, transform_indices = @transform_5, window_bounds = array<i64: 1, 128>}, {pipeline_mode = #tpu.pipeline_mode<synchronous>, transform_indices = @transform_6, window_bounds = array<i64: 4, 128>}, {pipeline_mode = #tpu.pipeline_mode<synchronous>, transform_indices = @transform_7, window_bounds = array<i64: 4, 1>}, {transform_indices = @transform_8, window_bounds = array<i64: 1, 4, 128>}]} {
    %c0 = arith.constant 0 : index
    %c0_0 = arith.constant 0 : index
    %c0_1 = arith.constant 0 : index
    %0 = vector.load %arg1[%c0, %c0_0, %c0_1] : memref<1x16x64xf32, #tpu.memory_space<vmem>>, vector<1x16x64xf32>
    %1 = vector.shape_cast %0 : vector<1x16x64xf32> to vector<16x64xf32>
    %c0_2 = arith.constant 0 : index
    %c0_3 = arith.constant 0 : index
    %2 = vector.load %arg3[%c0_2, %c0_3] : memref<64x128xf32, #tpu.memory_space<vmem>>, vector<64x128xf32>
    %cst = arith.constant dense<0.000000e+00> : vector<16x128xf32>
    %3 = tpu.matmul %1, %2, %cst {dimension_numbers = #tpu.dot_dimension_numbers<[1], [0], [0], [1], [0, 0, 1, 1], [], []>} : vector<16x64xf32>, vector<64x128xf32>, vector<16x128xf32> -> vector<16x128xf32>
    %c0_4 = arith.constant 0 : index
    %c0_5 = arith.constant 0 : index
    %4 = vector.load %arg4[%c0_4, %c0_5] : memref<1x128xf32, #tpu.memory_space<vmem>>, vector<1x128xf32>
    %5 = vector.broadcast %4 : vector<1x128xf32> to vector<16x128xf32>
    %6 = arith.addf %3, %5 : vector<16x128xf32>
    %cst_6 = arith.constant 0.000000e+00 : f32
    %7 = vector.broadcast %cst_6 : f32 to vector<16x128xf32>
    %8 = arith.maximumf %6, %7 : vector<16x128xf32>
    %c0_7 = arith.constant 0 : index
    %c0_8 = arith.constant 0 : index
    %c0_9 = arith.constant 0 : index
    %9 = vector.load %arg2[%c0_7, %c0_8, %c0_9] : memref<1x8x64xf32, #tpu.memory_space<vmem>>, vector<1x8x64xf32>
    %10 = vector.shape_cast %9 : vector<1x8x64xf32> to vector<8x64xf32>
    %c0_10 = arith.constant 0 : index
    %c0_11 = arith.constant 0 : index
    %11 = vector.load %arg5[%c0_10, %c0_11] : memref<64x128xf32, #tpu.memory_space<vmem>>, vector<64x128xf32>
    %cst_12 = arith.constant dense<0.000000e+00> : vector<8x128xf32>
    %12 = tpu.matmul %10, %11, %cst_12 {dimension_numbers = #tpu.dot_dimension_numbers<[1], [0], [0], [1], [0, 0, 1, 1], [], []>} : vector<8x64xf32>, vector<64x128xf32>, vector<8x128xf32> -> vector<8x128xf32>
    %c0_13 = arith.constant 0 : index
    %c0_14 = arith.constant 0 : index
    %13 = vector.load %arg6[%c0_13, %c0_14] : memref<1x128xf32, #tpu.memory_space<vmem>>, vector<1x128xf32>
    %14 = vector.broadcast %13 : vector<1x128xf32> to vector<8x128xf32>
    %15 = arith.addf %12, %14 : vector<8x128xf32>
    %cst_15 = arith.constant 0.000000e+00 : f32
    %16 = vector.broadcast %cst_15 : f32 to vector<8x128xf32>
    %17 = arith.maximumf %15, %16 : vector<8x128xf32>
    %18 = vector.shape_cast %8 : vector<16x128xf32> to vector<16x1x128xf32>
    %19 = vector.shape_cast %17 : vector<8x128xf32> to vector<1x8x128xf32>
    %20 = vector.broadcast %18 : vector<16x1x128xf32> to vector<16x8x128xf32>
    %21 = vector.broadcast %19 : vector<1x8x128xf32> to vector<16x8x128xf32>
    %22 = arith.mulf %20, %21 : vector<16x8x128xf32>
    %23 = vector.shape_cast %22 : vector<16x8x128xf32> to vector<128x128xf32>
    %c0_16 = arith.constant 0 : index
    %c0_17 = arith.constant 0 : index
    %24 = vector.load %arg7[%c0_16, %c0_17] : memref<4x128xf32, #tpu.memory_space<vmem>>, vector<4x128xf32>
    %cst_18 = arith.constant dense<0.000000e+00> : vector<4x128xf32>
    %25 = tpu.matmul %24, %23, %cst_18 {dimension_numbers = #tpu.dot_dimension_numbers<[1], [1], [0], [0], [0, 0, 1, 0], [], []>} : vector<4x128xf32>, vector<128x128xf32>, vector<4x128xf32> -> vector<4x128xf32>
    %c0_19 = arith.constant 0 : index
    %c0_20 = arith.constant 0 : index
    %26 = vector.load %arg8[%c0_19, %c0_20] : memref<4x1xf32, #tpu.memory_space<vmem>>, vector<4x1xf32>
    %27 = vector.broadcast %26 : vector<4x1xf32> to vector<4x128xf32>
    %28 = arith.addf %25, %27 : vector<4x128xf32>
    %c0_21 = arith.constant 0 : index
    %c0_22 = arith.constant 0 : index
    %c0_23 = arith.constant 0 : index
    %29 = vector.load %arg9[%c0_21, %c0_22, %c0_23] : memref<1x4x128xf32, #tpu.memory_space<vmem>>, vector<1x4x128xf32>
    %30 = vector.shape_cast %29 : vector<1x4x128xf32> to vector<4x128xf32>
    %31 = vector.shape_cast %28 : vector<4x128xf32> to vector<1x4x128xf32>
    tpu.vector_store %arg9[%c0_21, %c0_22, %c0_23], %31 {strides = array<i32>} : memref<1x4x128xf32, #tpu.memory_space<vmem>>, vector<1x4x128xf32>,
    return
  }
  func.func @transform_0(%arg0: i32) -> (i32, i32, i32) {
    %c0_i32 = arith.constant 0 : i32
    %c0_i32_0 = arith.constant 0 : i32
    %c0_i32_1 = arith.constant 0 : i32
    return %arg0, %c0_i32, %c0_i32_0 : i32, i32, i32
  }
  func.func @transform_1(%arg0: i32) -> (i32, i32, i32) {
    %c0_i32 = arith.constant 0 : i32
    %c0_i32_0 = arith.constant 0 : i32
    %c0_i32_1 = arith.constant 0 : i32
    return %arg0, %c0_i32, %c0_i32_0 : i32, i32, i32
  }
  func.func @transform_2(%arg0: i32) -> (i32, i32) {
    %c0_i32 = arith.constant 0 : i32
    %c0_i32_0 = arith.constant 0 : i32
    %c0_i32_1 = arith.constant 0 : i32
    return %c0_i32, %c0_i32_0 : i32, i32
  }
  func.func @transform_3(%arg0: i32) -> (i32, i32) {
    %c0_i32 = arith.constant 0 : i32
    %c0_i32_0 = arith.constant 0 : i32
    %c0_i32_1 = arith.constant 0 : i32
    return %c0_i32, %c0_i32_0 : i32, i32
  }
  func.func @transform_4(%arg0: i32) -> (i32, i32) {
    %c0_i32 = arith.constant 0 : i32
    %c0_i32_0 = arith.constant 0 : i32
    %c0_i32_1 = arith.constant 0 : i32
    return %c0_i32, %c0_i32_0 : i32, i32
  }
  func.func @transform_5(%arg0: i32) -> (i32, i32) {
    %c0_i32 = arith.constant 0 : i32
    %c0_i32_0 = arith.constant 0 : i32
    %c0_i32_1 = arith.constant 0 : i32
    return %c0_i32, %c0_i32_0 : i32, i32
  }
  func.func @transform_6(%arg0: i32) -> (i32, i32) {
    %c0_i32 = arith.constant 0 : i32
    %c0_i32_0 = arith.constant 0 : i32
    %c0_i32_1 = arith.constant 0 : i32
    return %c0_i32, %c0_i32_0 : i32, i32
  }
  func.func @transform_7(%arg0: i32) -> (i32, i32) {
    %c0_i32 = arith.constant 0 : i32
    %c0_i32_0 = arith.constant 0 : i32
    %c0_i32_1 = arith.constant 0 : i32
    return %c0_i32, %c0_i32_0 : i32, i32
  }
  func.func @transform_8(%arg0: i32) -> (i32, i32, i32) {
    %c0_i32 = arith.constant 0 : i32
    %c0_i32_0 = arith.constant 0 : i32
    %c0_i32_1 = arith.constant 0 : i32
    return %arg0, %c0_i32, %c0_i32_0 : i32, i32, i32
  }
}

</mosaic_0001>

<bundles_post_ra>
// kernel: tpu_custom_call.1
= control target key start
LH: loop header
LB: loop body
LE: loop exit
PB: predicated region body
PF: predicated region fallthrough
CT: control target
= control target key end

     0   :  { %s1823_s0 = inlined_call_operand.hbm [shape: f32[2,16,64], index: 0, kind: input, shape index: {}]   ;;  %s1824_s1 = inlined_call_operand.hbm [shape: f32[2,8,64], index: 1, kind: input, shape index: {}]   ;;  %s1825_s2 = inlined_call_operand.hbm [shape: f32[64,128], index: 2, kind: input, shape index: {}]   ;;  %s1826_s3 = inlined_call_operand.vmem [shape: f32[1,128], index: 3, kind: input, shape index: {}]   ;;  %s1827_s4 = inlined_call_operand.hbm [shape: f32[64,128], index: 4, kind: input, shape index: {}]   ;;  %s1828_s5 = inlined_call_operand.vmem [shape: f32[1,128], index: 5, kind: input, shape index: {}]   ;;  %s1829_s6 = inlined_call_operand.vmem [shape: f32[4,128], index: 6, kind: input, shape index: {}]   ;;  %s1830_s7 = inlined_call_operand.vmem [shape: f32[4,1], index: 7, kind: input, shape index: {}]   ;;  %s1831_s8 = inlined_call_operand.hbm [shape: f32[2,4,128], index: 8, kind: output, shape index: {}]  }
   0x1   :  { %1841 = sst [smem:[#allocation19_spill]] %s1823_s0 }
   0x2   :  { %1842 = sst [smem:[#allocation20_spill]] %s1825_s2 }
   0x3   :  { %1843 = sst [smem:[#allocation21_spill]] %s1827_s4 }
   0x4   :  { %13 = vsyncpa [#allocation3], 0 }
   0x5   :  { %15 = vsyncpa [#allocation3 + $0x1], 0 }
   0x6   :  { %16 = vsyncpa [#allocation6], 0 }
   0x7   :  { %18 = vsyncpa [#allocation6 + $0x1], 0 }
   0x8   :  { %19 = vsyncpa [#allocation9], 0 }
   0x9   :  { %20 = vsyncpa [#allocation4], 0 }
   0xa   :  { %22 = vsyncpa [#allocation4 + $0x1], 0  ;;  %s1501_s27 = smov 0   ;;  %s1503_s28 = smov 0  }
   0xb   :  { %s1505_s29 = smov 0   ;;  %s1507_s30 = smov 0  }
   0xc LB: > { %1844 = sst [smem:[#allocation16_spill]] %s1438_s29  ;;  %s1522_s9 = sadd.s32 4294967295, %s1442_s30   ;;  %s1442_s30 = sphi %s1507_s30, %s1869_s30   ;;  %s1438_s29 = sphi %s1505_s29, %s1871_s29   ;;  %s1434_s28 = sphi %s1503_s28, %s1873_s28   ;;  %s1430_s27 = sphi %s1501_s27, %s1872_s27  }
   0xd   : > { %s981_s10 = sadd.s32 4294967294, %s1442_s30   ;;  %p48_p0 = scmp.ne.s32.totalorder %s1434_s28, %s1430_s27 }
   0xe   : > { %p1832_p1 = scmp.eq.s32.totalorder %s1522_s9, 0  ;;  %p230_p3 = scmp.eq.s32.totalorder %s981_s10, 1 }
   0xf   : > { %p982_p5 = scmp.ge.s32.totalorder %s1442_s30, 1  ;;  %p237_p7 = scmp.lt.s32.totalorder %s1442_s30, 3 }
  0x10   : > { %p1531_p4 = por %p1832_p1, %p48_p0  ;;  %p1536_p6 = por %p230_p3, %p48_p0 }
  0x11   : > { %p1541_p8 = pnand %p982_p5, %p237_p7  ;;  %s1444_s14 = smov [#allocation7]  }
  0x12   : > { %s1845_s11 = scalar_select %p1531_p4, 1, 0 }
  0x13   : > { %s1846_s12 = scalar_select %p1536_p6, 1, 0 }
  0x14   : > { %s1847_s13 = scalar_select %p1541_p8, 1, 0 }
  0x15   : > { %s249_s15 = sshll.u32 %s1444_s14, 4  ;;  %p1182_p9 = pneg %p1541_p8  ;;  %s1545_s15 = int_to_ptr.vmem [resolvable:$true] %s249_s15 }
  0x16   : > { %s1445_s17 = smov [#allocation8]   ;;  %s1849_s2 = sld [smem:[#allocation20_spill]] }
  0x17   : > { %p1552_p11 = pnand %p1182_p9, %p1832_p1  ;;  %s265_s18 = sshll.u32 %s1445_s17, 4  ;;  %s1556_s18 = int_to_ptr.vmem [resolvable:$true] %s265_s18 }
  0x19   : > { %p1250_p13 = pneg %p1552_p11 }
  0x1c   : > { %s1248_s21 = scalar_lea.hbm %s1849_s2, 1024 }
  0x1d   : > { %p1249_p12 = scmp.ne.s32.totalorder %s1849_s2, %s1248_s21  ;;  %p1255_p5 = scmp.lt.u32.totalorder %s1248_s21, %s1849_s2 }
  0x1f   : > { %p1251_p0 = pnand %p1250_p13, %p1249_p12 }
  0x21   : > { %p1252_p3 = pneg %p1251_p0 }
  0x23   : > { %p1257_p7 = pnand %p1255_p5, %p1252_p3 }
  0x25   : > { %1260 = shalt.err (!%p1257_p7)
}
  0x26   : > { %s1261_s26 = scalar_lea.vmem %s1545_s15, 1024  ;;  %p1269_p2 = scmp.lt.s32.totalorder %s1545_s15, %s1545_s15 }
  0x27   : > { %p1262_p9 = scmp.ne.s32.totalorder %s1545_s15, %s1261_s26  ;;  %p1270_p12 = scmp.lt.s32.totalorder %s1261_s26, %s1261_s26 }
  0x29   : > { %p1264_p10 = pnand %p1262_p9, %p1250_p13  ;;  %p1271_p0 = por %p1270_p12, %p1269_p2 }
  0x2b   : > { %p1265_p1 = pneg %p1264_p10 }
  0x2d   : > { %p1272_p6 = pnand %p1271_p0, %p1265_p1 }
  0x2f   : > { %1275 = shalt.err (!%p1272_p6)
}
  0x30   : > { %s1833_s10 = smov 128   ;;  %s1834_s14 = smov 8  }
  0x31   : > { %1185 = dma.hbm_to_vmem [thread:$0]  (!%p1552_p11), %s1849_s2, 1024, %s1545_s15, [#allocation6], %s1833_s10, %s1833_s10, %s1834_s14  }
  0x32   : > { %s1850_s4 = sld [smem:[#allocation21_spill]] }
  0x38   : > { %s1276_s22 = scalar_lea.hbm %s1850_s4, 1024 }
  0x39   : > { %p1277_p1 = scmp.ne.s32.totalorder %s1850_s4, %s1276_s22  ;;  %p1283_p10 = scmp.lt.u32.totalorder %s1276_s22, %s1850_s4 }
  0x3b   : > { %p1279_p2 = pnand %p1277_p1, %p1250_p13 }
  0x3d   : > { %p1280_p6 = pneg %p1279_p2 }
  0x3f   : > { %p1285_p3 = pnand %p1283_p10, %p1280_p6 }
  0x41   : > { %1288 = shalt.err (!%p1285_p3)
}
  0x42   : > { %s1289_s15 = scalar_lea.vmem %s1556_s18, 1024  ;;  %p1297_p12 = scmp.lt.s32.totalorder %s1556_s18, %s1556_s18 }
  0x43   : > { %p1290_p5 = scmp.ne.s32.totalorder %s1556_s18, %s1289_s15  ;;  %p1298_p0 = scmp.lt.s32.totalorder %s1289_s15, %s1289_s15 }
  0x45   : > { %p1292_p7 = pnand %p1290_p5, %p1250_p13  ;;  %p1299_p1 = por %p1298_p0, %p1297_p12 }
  0x47   : > { %p1293_p9 = pneg %p1292_p7 }
  0x49   : > { %p1300_p2 = pnand %p1299_p1, %p1293_p9 }
  0x4b   : > { %1303 = shalt.err (!%p1300_p2)
}
  0x4c   : > { %1188 = dma.hbm_to_vmem [thread:$0]  (!%p1552_p11), %s1850_s4, 1024, %s1556_s18, [#allocation9], %s1833_s10, %s1833_s10, %s1834_s14  }
  0x4d   : > { %s1617_s16 = sadd.s32 1, %s1442_s30   ;;  %s35_s20 = sadd.s32 1, %s1438_s29 }
  0x4e   : > { %1851 = sst [smem:[#allocation17_spill]] %s1617_s16  ;;  %s32_s21 = ssub.s32 %s1442_s30, %s1617_s16 }
  0x4f   : > { %p42_p13 = scmp.ne.s32.totalorder %s1438_s29, %s1434_s28  ;;  %p33_p6 = scmp.eq.s32.totalorder %s32_s21, 0 }
  0x50   : > { %p43_p10 = scmp.eq.s32.totalorder %s1442_s30, 0  ;;  %p1852_p3 = scmp.eq.s32.totalorder %s1522_s9, 1 }
  0x51   : > { %p1202_p7 = scmp.lt.s32.totalorder %s1442_s30, 2  ;;  %s1636_s24 = sand.u32 1, %s1438_s29  }
  0x52   : > { %p1627_p5 = por %p1852_p3, %p42_p13  ;;  %p44_p9 = por %p43_p10, %p42_p13 }
  0x53   : > { %s1633_s23 = scalar_select %p33_p6, %s1438_s29, %s35_s20  }
  0x54   : > { %s1853_s22 = scalar_select %p1627_p5, 1, 0 }
  0x55   : > { %1854 = sst [smem:[#allocation18_spill]] %s1633_s23  ;;  %s986_s18 = sshll.u32 %s1636_s24, 4 }
  0x56   : > { %s1006_s25 = sshll.u32 %s1442_s30, 8  ;;  %s1855_s0 = sld [smem:[#allocation19_spill]] }
  0x57   : > { %s292_s19 = scalar_lea.vmem [#allocation2], %s986_s18  ;;  %p1647_p11 = pnand %p1202_p7, %p44_p9 }
  0x58   : > { %s299_s20 = sshll.u32 %s292_s19, 4  ;;  %s989_s14 = sshll.u32 %s1636_s24, 3  ;;  %s1645_s20 = int_to_ptr.vmem [resolvable:$true] %s299_s20 }
  0x59   : > { %s289_s2 = scalar_lea.sflag [#allocation3], %s1636_s24  ;;  %p1306_p0 = pneg %p1647_p11 }
  0x5c   : > { %s1643_s17 = scalar_lea.hbm %s1855_s0, %s1006_s25  ;;  %s1309_s15 = scalar_lea.hbm %s1855_s0, 512 }
  0x5d   : > { %s1304_s26 = scalar_lea.hbm %s1643_s17, 256  ;;  %p1310_p13 = scmp.lt.u32.totalorder %s1643_s17, %s1855_s0 }
  0x5e   : > { %p1305_p12 = scmp.ne.s32.totalorder %s1643_s17, %s1304_s26  ;;  %p1311_p6 = scmp.lt.u32.totalorder %s1309_s15, %s1304_s26 }
  0x5f   : > { %p1313_p3 = scmp.lt.u32.totalorder %s1304_s26, %s1643_s17 }
  0x60   : > { %p1307_p1 = pnand %p1306_p0, %p1305_p12  ;;  %p1312_p10 = por %p1311_p6, %p1310_p13 }
  0x62   : > { %p1308_p2 = pneg %p1307_p1  ;;  %p1314_p7 = por %p1313_p3, %p1312_p10 }
  0x64   : > { %p1315_p9 = pnand %p1314_p7, %p1308_p2 }
  0x66   : > { %1318 = shalt.err (!%p1315_p9)
}
  0x67   : > { %s1319_s10 = scalar_lea.vmem %s1645_s20, 256  ;;  %s1448_s18 = smov [#allocation2]  }
  0x68   : > { %p1320_p12 = scmp.ne.s32.totalorder %s1645_s20, %s1319_s10  ;;  %s1324_s25 = sshll.u32 %s1448_s18, 4  ;;  %s1325_s25 = int_to_ptr.vmem [resolvable:$false] %s1324_s25 }
  0x69   : > { %s1326_s4 = scalar_lea.vmem %s1325_s25, 512  ;;  %p1327_p4 = scmp.lt.s32.totalorder %s1645_s20, %s1325_s25 }
  0x6a   : > { %p1322_p1 = pnand %p1320_p12, %p1306_p0  ;;  %p1328_p13 = scmp.lt.s32.totalorder %s1326_s4, %s1319_s10 }
  0x6c   : > { %p1323_p5 = pneg %p1322_p1  ;;  %p1329_p6 = por %p1328_p13, %p1327_p4 }
  0x6e   : > { %p1330_p10 = pnand %p1329_p6, %p1323_p5 }
  0x70   : > { %1333 = shalt.err (!%p1330_p10)
}
  0x71   : > { %s1857_s26 = smov 8   ;;  %s1858_s15 = smov 128  }
  0x72   : > { %1192 = dma.hbm_to_vmem [thread:$0]  (!%p1647_p11), %s1643_s17, 256, %s1645_s20, %s289_s2, %s1858_s15, %s1858_s15, %s1857_s26  }
  0x73   : > { %s990_s19 = sshll.u32 %s1442_s30, 7  ;;  %s313_s4 = scalar_lea.vmem [#allocation5], %s989_s14 }
  0x74   : > { %s1688_s25 = scalar_lea.hbm %s1824_s1, %s990_s19  ;;  %s320_s0 = sshll.u32 %s313_s4, 4  ;;  %s321_s0 = int_to_ptr.vmem [resolvable:$true] %s320_s0 }
  0x75   : > { %s1859_s23 = sand.u32 1, %s1442_s30   ;;  %s1334_s16 = scalar_lea.hbm %s1688_s25, 128 }
  0x76   : > { %s310_s29 = scalar_lea.sflag [#allocation6], %s1859_s23  ;;  %p1335_p4 = scmp.ne.s32.totalorder %s1688_s25, %s1334_s16 }
  0x77   : > { %s1339_s20 = scalar_lea.hbm %s1824_s1, 256  ;;  %p1340_p3 = scmp.lt.u32.totalorder %s1688_s25, %s1824_s1 }
  0x78   : > { %p1337_p5 = pnand %p1335_p4, %p1306_p0  ;;  %p1341_p7 = scmp.lt.u32.totalorder %s1339_s20, %s1334_s16 }
  0x79   : > { %p1343_p12 = scmp.lt.u32.totalorder %s1334_s16, %s1688_s25 }
  0x7a   : > { %p1338_p2 = pneg %p1337_p5  ;;  %p1342_p9 = por %p1341_p7, %p1340_p3 }
  0x7c   : > { %p1344_p1 = por %p1343_p12, %p1342_p9 }
  0x7e   : > { %p1345_p13 = pnand %p1344_p1, %p1338_p2 }
  0x80   : > { %1348 = shalt.err (!%p1345_p13)
}
  0x81   : > { %s1349_s14 = scalar_lea.vmem %s321_s0, 128  ;;  %s1449_s23 = smov [#allocation5]  }
  0x82   : > { %p1350_p6 = scmp.ne.s32.totalorder %s321_s0, %s1349_s14  ;;  %s1354_s15 = sshll.u32 %s1449_s23, 4  ;;  %s1355_s15 = int_to_ptr.vmem [resolvable:$false] %s1354_s15 }
  0x83   : > { %s1356_s19 = scalar_lea.vmem %s1355_s15, 256  ;;  %p1357_p5 = scmp.lt.s32.totalorder %s321_s0, %s1355_s15 }
  0x84   : > { %p1352_p10 = pnand %p1350_p6, %p1306_p0  ;;  %p1358_p8 = scmp.lt.s32.totalorder %s1356_s19, %s1349_s14 }
  0x86   : > { %p1353_p4 = pneg %p1352_p10  ;;  %p1359_p3 = por %p1358_p8, %p1357_p5 }
  0x88   : > { %p1360_p7 = pnand %p1359_p3, %p1353_p4 }
  0x8a   : > { %1363 = shalt.err (!%p1360_p7)
}
  0x8b   : > { %1195 = dma.hbm_to_vmem [thread:$0]  (!%p1647_p11), %s1688_s25, 128, %s321_s0, %s310_s29  }
  0x8c   : > { %p1860_p2 = scmp.ne.s32.totalorder %s1847_s13, 0 }
  0x8d   : > { %s1716_s16 = sand.u32 (!%p1860_p2), 1, %s1434_s28   ;;  %p1861_p8 = scmp.ne.s32.totalorder (!%p1860_p2), %s1845_s11, 0 }
  0x8e   : > { %329 = sbr.rel (%p1860_p2) target bundleno = 707 (0x2c3), region = 52  ;;  %s992_s18 = sshll.u32 (!%p1860_p2), %s1716_s16, 4 }
  0x8f   : > { %s332_s10 = scalar_lea.sflag (!%p1860_p2), [#allocation3], %s1716_s16  ;;  %s1720_s4 = scalar_lea.vmem (!%p1860_p2), [#allocation2], %s992_s18 }
  0x95   : > { %1409 = dma.done.wait (%p1861_p8), %s332_s10, 256  }
  0x96   : > { %1411 = vsyncadd (%p1861_p8), %s332_s10, 4294967040  ;;  %s340_s0 = sand.u32 1, %s1522_s9   ;;  %s993_s29 = sshll.u32 %s1716_s16, 3 }
  0x97   : > { %s341_s13 = scalar_lea.sflag [#allocation6], %s340_s0  ;;  %s1728_s21 = scalar_lea.vmem [#allocation5], %s993_s29 }
  0x98   : > { %1413 = dma.done.wait (%p1861_p8), %s341_s13, 128  }
  0x99   : > { %1415 = vsyncadd (%p1861_p8), %s341_s13, 4294967168  ;;  %p1862_p11 = scmp.eq.s32.totalorder %s1522_s9, 0 }
  0x9b   : > { %1417 = dma.done.wait (%p1862_p11), [#allocation6], 1024   ;;  %p1863_p0 = pmov %p1862_p11 }
  0x9d   : > { %1419 = vsyncadd (%p1863_p0), [#allocation6], 4294966272  ;;  %p1864_p9 = pmov %p1863_p0 }
  0x9e   : > { %p1865_p12 = pmov %p1863_p0 }
  0x9f   : > { %1421 = dma.done.wait (%p1864_p9), [#allocation9], 1024  }
  0xa0   : > { %1423 = vsyncadd (%p1865_p12), [#allocation9], 4294966272  ;;  %v1450_v0 = vmov 0.0|0.0   ;;  %vm1451_vm0 = vmmov 0   ;;  %v1452_v1 = vmov 0.0   ;;  %v392_v2 = vld [vmem:[#allocation7] sm:$0xff]  ;;  %v587_v33 = vlaneseq }
  0xa1   : > { %1144 = vmatprep.subr.bf16.mxu0 %v1450_v0  ;;  %1113 = vmatprep.mubr.msk.f32.mxu0 %vm1451_vm0, %v1452_v1  ;;  %v393_v3 = vld [vmem:[#allocation7 + $0x8] sm:$0xff]  ;;  %v394_v4 = vld [vmem:[#allocation7 + $0x10] sm:$0xff]  ;;  %vm407_vm1 = vcmask 523264   ;;  %v395_v6 = vld [vmem:[#allocation7 + $0x18] sm:$0xff]  ;;  %v1453_v30 = vmov 0   ;;  %s996_s23 = sshll.u32 %s1716_s16, 2 }
  0xa2   : > { %v1116_v5 = vpack.c.bf16 %v393_v3, %v392_v2  ;;  %v1120_v7 = vpack.c.bf16 %v395_v6, %v394_v4  ;;  %v396_v8 = vld [vmem:[#allocation7 + $0x20] sm:$0xff]  ;;  %v397_v9 = vld [vmem:[#allocation7 + $0x28] sm:$0xff]  ;;  %v398_v12 = vld [vmem:[#allocation7 + $0x30] sm:$0xff]  ;;  %1247 = vset.pattern.permute.xlu0 %v1453_v30  ;;  %v1454_v31 = vmov 1966171168   ;;  %v588_v35 = vshrl.u32 %v587_v33, 7 }
  0xa3   : > { %v390_v10 = vld [vmem:[%s1720_s4] sm:$0xff]  ;;  %v1124_v11 = vpack.c.bf16 %v397_v9, %v396_v8  ;;  %v399_v13 = vld [vmem:[#allocation7 + $0x38] sm:$0xff]  ;;  %v493_v16 = vld [vmem:[#allocation8 + $0x8] sm:$0xff]  ;;  %v585_v32 = vunpack.c.l.s4 %v1454_v31  ;;  %s1003_s15 = sshll.u32 %s1522_s9, 6  ;;  %s389_s19 = scalar_lea.vmem [#allocation10], %s996_s23 }
  0xa4   : > { %1117 = vmatprep.subr.bf16.mxu1 %v1116_v5  ;;  %1059 = vmatprep.mubr.msk.f32.mxu1 %vm407_vm1, %v390_v10  ;;  %v1128_v14 = vpack.c.bf16 %v399_v13, %v398_v12  ;;  %v492_v15 = vld [vmem:[#allocation8] sm:$0xff]  ;;  %v391_v17 = vld [vmem:[%s1720_s4 + $0x8] sm:$0xff]  ;;  %v494_v19 = vld [vmem:[#allocation8 + $0x10] sm:$0xff]  ;;  %v683_v59 = vsub.s32 0, %v588_v35  ;;  %s869_s18 = sshll.u32 %s389_s19, 4  ;;  %s1779_s0 = scalar_lea.hbm %s1831_s8, %s1003_s15  ;;  %s1781_s18 = int_to_ptr.vmem [resolvable:$true] %s869_s18 }
  0xa5   : > { %1119 = vmatpush3.bf16.msra.mxu1 %v1116_v5  ;;  %v1133_v18 = vpack.c.bf16 %v493_v16, %v492_v15  ;;  %v495_v20 = vld [vmem:[#allocation8 + $0x18] sm:$0xff]  ;;  %v496_v22 = vld [vmem:[#allocation8 + $0x20] sm:$0xff]  ;;  %v497_v23 = vld [vmem:[#allocation8 + $0x28] sm:$0xff]  ;;  %v586_v34 = vunpack.c.0.s8 %v585_v32  ;;  %s856_s29 = scalar_lea.sflag [#allocation4], %s1716_s16  ;;  %s1364_s13 = scalar_lea.vmem %s1781_s18, 64 }
  0xa6   : > { %1121 = vmatprep.subr.bf16.mxu1 %v1120_v7  ;;  %v1136_v21 = vpack.c.bf16 %v495_v20, %v494_v19  ;;  %v1139_v24 = vpack.c.bf16 %v497_v23, %v496_v22  ;;  %v498_v25 = vld [vmem:[#allocation8 + $0x30] sm:$0xff]  ;;  %v499_v26 = vld [vmem:[#allocation8 + $0x38] sm:$0xff]  ;;  %p1365_p1 = scmp.ne.s32.totalorder %s1781_s18, %s1364_s13  ;;  %p1866_p13 = scmp.ne.s32.totalorder %s1853_s22, 0 }
  0xa7   : > { %v1142_v27 = vpack.c.bf16 %v499_v26, %v498_v25  ;;  %v491_v28 = vld [vmem:[%s1728_s21] sm:$0xff]  ;;  %v589_v39 = vsub.s32 %v586_v34, %v588_v35  ;;  %s1455_s9 = smov [#allocation10]  }
  0xa8   : > { %v778_v29 = vld [vmem:[%s1830_s7] sm:$0xf]  ;;  %p1366_p6 = pnand %p1365_p1, %p1866_p13  ;;  %s1368_s21 = sshll.u32 %s1455_s9, 4  ;;  %s1369_s21 = int_to_ptr.vmem [resolvable:$false] %s1368_s21 }
  0xa9   : > { %1123 = vmatpush3.bf16.msra.mxu1 %v1120_v7  ;;  %781 = vperm.xlu0 %1247, %v778_v29   ;;  %v997_v36 = vld [vmem:[%s1826_s3] ss:$0 sm:$0xff]  ;;  %s1370_s11 = scalar_lea.vmem %s1369_s21, 128  ;;  %p1371_p4 = scmp.lt.s32.totalorder %s1781_s18, %s1369_s21 }
  0xaa   : > { %1125 = vmatprep.subr.bf16.mxu1 %v1124_v11  ;;  %v1000_v3 = vld [vmem:[%s1828_s5] ss:$0 sm:$0xff]  ;;  %p1367_p10 = pneg %p1366_p6  ;;  %p1372_p5 = scmp.lt.s32.totalorder %s1370_s11, %s1364_s13 }
  0xac   : > { %p1373_p3 = por %p1372_p5, %p1371_p4 }
  0xad   : > { %1127 = vmatpush3.bf16.msra.mxu1 %v1124_v11 }
  0xae   : > { %1129 = vmatprep.subr.bf16.mxu1 %v1128_v14  ;;  %p1374_p7 = pnand %p1373_p3, %p1367_p10 }
  0xb1   : > { %1131 = vmatpush3.bf16.msra.mxu1 %v1128_v14 }
  0xb2   : > { %1132 = vmatprep.subr.bf16.mxu1 %v1450_v0 }
  0xb4   : > { %1060 = vmatmul.mubr.msk.f32.vlgmr.msra.gmra.mrb[0].mxu1 %vm407_vm1, %v391_v17 }
  0xb5   : > { %1134 = vmatpush3.bf16.msra.mxu1 %v1133_v18  ;;  %1078 = vmatprep.mubr.msk.f32.mxu1 %vm1451_vm0, %v1452_v1 }
  0xb6   : > { %1135 = vmatprep.subr.bf16.mxu1 %v1450_v0 }
  0xb9   : > { %1137 = vmatpush3.bf16.msra.mxu1 %v1136_v21 }
  0xba   : > { %1138 = vmatprep.subr.bf16.mxu1 %v1450_v0 }
  0xbd   : > { %1140 = vmatpush3.bf16.msra.mxu1 %v1139_v24 }
  0xbe   : > { %1141 = vmatprep.subr.bf16.mxu1 %v1450_v0 }
  0xc1   : > { %1143 = vmatpush3.bf16.msra.mxu1 %v1142_v27 }
  0xc4   : > { %1079 = vmatmul.mubr.msk.f32.vlgmr.msra.gmra.mrb[2].mxu1 %vm407_vm1, %v491_v28 }
 0x187   : > { %v1061_v37 = vpop.f32.mrb[0].mxu1 }
 0x188   : > { %v486_v38 = vadd.f32 %v1061_v37, %v997_v36  ;;  %v480_v40 = vpop.f32.mrb[1].mxu1 }
 0x189   : > { %v481_v41 = vadd.f32 %v997_v36, %v480_v40 }
 0x18a   : > { %v490_v42 = vmax.f32 %v486_v38, 0.0 }
 0x18b   : > { %v489_v43 = vmax.f32 %v481_v41, 0.0 }
 0x18c   : > { %v632_v44 = vcombine.high %v490_v42, %v490_v42  ;;  %v639_v45 = vrot.slane %v490_v42, %v589_v39 }
 0x18d   : > { %v583_v46 = vcombine.high %v489_v43, %v489_v43  ;;  %v590_v47 = vrot.slane %v489_v43, %v589_v39 }
 0x18e   : > { %v646_v48 = vrot.slane %v632_v44, %v589_v39  ;;  %v647_v49 = vcombine.high %v639_v45, %v639_v45  ;;  %v655_v57 = vrot.slane %v639_v45, %v589_v39 }
 0x18f   : > { %v597_v50 = vrot.slane %v583_v46, %v589_v39  ;;  %v598_v51 = vcombine.high %v590_v47, %v590_v47  ;;  %v606_v53 = vrot.slane %v590_v47, %v589_v39 }
 0x190   : > { %v648_v52 = vcombine.high %v646_v48, %v646_v48  ;;  %v669_v58 = vrot.slane %v647_v49, %v589_v39  ;;  %v662_v60 = vrot.slane %v646_v48, %v589_v39  ;;  %v677_v4 = vcombine.high %v655_v57, %v655_v57 }
 0x191   : > { %v599_v54 = vcombine.high %v597_v50, %v597_v50  ;;  %v613_v55 = vrot.slane %v597_v50, %v589_v39  ;;  %v620_v56 = vrot.slane %v598_v51, %v589_v39  ;;  %v628_v63 = vcombine.high %v606_v53, %v606_v53 }
 0x192   : > { %v676_v61 = vrot.slane %v648_v52, %v589_v39  ;;  %v679_v5 = vcombine.high %v669_v58, %v669_v58  ;;  %v716_v6 = vrot.slane %v655_v57, %v683_v59  ;;  %v678_v7 = vcombine.high %v662_v60, %v662_v60 }
 0x193   : > { %v627_v62 = vrot.slane %v599_v54, %v589_v39  ;;  %v629_v1 = vcombine.high %v613_v55, %v613_v55  ;;  %v630_v2 = vcombine.high %v620_v56, %v620_v56  ;;  %v684_v9 = vrot.slane %v606_v53, %v683_v59  ;;  %v777_v53 = vld [vmem:[%s1829_s6] sm:$0xf]  ;;  %v782_v54 = vpop.permute.xlu0 %781 }
 0x194   : > { %v680_v11 = vcombine.high %v676_v61, %v676_v61  ;;  %v688_v14 = vrot.slane %v620_v56, %v683_v59  ;;  %v692_v15 = vrot.slane %v628_v63, %v683_v59  ;;  %v700_v16 = vrot.slane %v613_v55, %v683_v59 }
 0x195   : > { %v631_v10 = vcombine.high %v627_v62, %v627_v62  ;;  %v696_v17 = vrot.slane %v630_v2, %v683_v59  ;;  %v704_v18 = vrot.slane %v627_v62, %v683_v59  ;;  %v708_v19 = vrot.slane %v629_v1, %v683_v59 }
 0x196   : > { %v720_v20 = vrot.slane %v669_v58, %v683_v59  ;;  %v724_v22 = vrot.slane %v677_v4, %v683_v59  ;;  %v728_v23 = vrot.slane %v679_v5, %v683_v59  ;;  %v732_v24 = vrot.slane %v662_v60, %v683_v59 }
 0x197   : > { %v576_v8 = vpop.f32.mrb[2].mxu1  ;;  %v712_v25 = vrot.slane %v631_v10, %v683_v59  ;;  %v736_v26 = vrot.slane %v676_v61, %v683_v59  ;;  %v740_v27 = vrot.slane %v678_v7, %v683_v59  ;;  %v744_v28 = vrot.slane %v680_v11, %v683_v59 }
 0x198   : > { %v577_v12 = vadd.f32 %v1000_v3, %v576_v8  ;;  %v1080_v13 = vpop.f32.mrb[3].mxu1 }
 0x19a   : > { %v580_v21 = vmax.f32 %v577_v12, 0.0 }
 0x19c   : > { %v761_v29 = vmul.f32 %v684_v9, %v580_v21  ;;  %v762_v30 = vmul.f32 %v688_v14, %v580_v21  ;;  %v763_v31 = vmul.f32 %v692_v15, %v580_v21  ;;  %v764_v32 = vmul.f32 %v696_v17, %v580_v21 }
 0x19d   : > { %v765_v33 = vmul.f32 %v700_v16, %v580_v21  ;;  %v766_v34 = vmul.f32 %v704_v18, %v580_v21  ;;  %v767_v35 = vmul.f32 %v708_v19, %v580_v21  ;;  %v768_v36 = vmul.f32 %v712_v25, %v580_v21 }
 0x19e   : > { %v1145_v37 = vpack.c.bf16 %v762_v30, %v761_v29  ;;  %v1148_v38 = vpack.c.bf16 %v764_v32, %v763_v31  ;;  %v769_v39 = vmul.f32 %v716_v6, %v580_v21  ;;  %v770_v40 = vmul.f32 %v720_v20, %v580_v21 }
 0x19f   : > { %v1151_v41 = vpack.c.bf16 %v766_v34, %v765_v33  ;;  %v1154_v42 = vpack.c.bf16 %v768_v36, %v767_v35  ;;  %v771_v43 = vmul.f32 %v724_v22, %v580_v21  ;;  %v772_v44 = vmul.f32 %v728_v23, %v580_v21 }
 0x1a0   : > { %1146 = vmatpush3.bf16.xpose.msra.mxu0 %v1145_v37  ;;  %v1157_v45 = vpack.c.bf16 %v770_v40, %v769_v39  ;;  %v773_v46 = vmul.f32 %v732_v24, %v580_v21  ;;  %v774_v47 = vmul.f32 %v736_v26, %v580_v21  ;;  %v775_v48 = vmul.f32 %v740_v27, %v580_v21 }
 0x1a1   : > { %1147 = vmatprep.subr.bf16.mxu0 %v1450_v0  ;;  %v1160_v49 = vpack.c.bf16 %v772_v44, %v771_v43  ;;  %v776_v50 = vmul.f32 %v744_v28, %v580_v21 }
 0x1a2   : > { %v1163_v51 = vpack.c.bf16 %v774_v47, %v773_v46 }
 0x1a3   : > { %v1166_v52 = vpack.c.bf16 %v776_v50, %v775_v48 }
 0x1a8   : > { %1149 = vmatpush3.bf16.xpose.msra.mxu0 %v1148_v38 }
 0x1a9   : > { %1150 = vmatprep.subr.bf16.mxu0 %v1450_v0 }
 0x1b0   : > { %1152 = vmatpush3.bf16.xpose.msra.mxu0 %v1151_v41 }
 0x1b1   : > { %1153 = vmatprep.subr.bf16.mxu0 %v1450_v0 }
 0x1b8   : > { %1155 = vmatpush3.bf16.xpose.msra.mxu0 %v1154_v42 }
 0x1b9   : > { %1156 = vmatprep.subr.bf16.mxu0 %v1450_v0 }
 0x1c0   : > { %1158 = vmatpush3.bf16.xpose.msra.mxu0 %v1157_v45 }
 0x1c1   : > { %1159 = vmatprep.subr.bf16.mxu0 %v1450_v0 }
 0x1c8   : > { %1161 = vmatpush3.bf16.xpose.msra.mxu0 %v1160_v49 }
 0x1c9   : > { %1162 = vmatprep.subr.bf16.mxu0 %v1450_v0 }
 0x1d0   : > { %1164 = vmatpush3.bf16.xpose.msra.mxu0 %v1163_v51 }
 0x1d1   : > { %1165 = vmatprep.subr.bf16.mxu0 %v1450_v0 }
 0x1d8   : > { %1167 = vmatpush3.bf16.xpose.msra.mxu0 %v1166_v52 }
 0x1df   : > { %1114 = vmatmul.mubr.f32.vlgmr.msra.gmra.mrb[0].mxu0 %v777_v53 }
 0x2b2   : > { %v850_v55 = vpop.f32.mrb[0].mxu0 }
 0x2b3   : > { %v851_v56 = vadd.f32 %v850_v55, %v782_v54  ;;  %v1115_v57 = vpop.f32.mrb[1].mxu0 }
 0x2b5   : > { %854 = vst [vmem:[%s389_s19] sm:$0xf] %v851_v56 }
 0x2b6   : > { %1377 = shalt.err (!%p1374_p7)
}
 0x2b7   : > { %s1378_s16 = scalar_lea.hbm %s1779_s0, 64  ;;  %s1382_s17 = scalar_lea.hbm %s1831_s8, 128 }
 0x2b8   : > { %p1379_p2 = scmp.ne.s32.totalorder %s1779_s0, %s1378_s16  ;;  %p1383_p0 = scmp.lt.u32.totalorder %s1779_s0, %s1831_s8 }
 0x2b9   : > { %p1384_p9 = scmp.lt.u32.totalorder %s1382_s17, %s1378_s16  ;;  %p1386_p1 = scmp.lt.u32.totalorder %s1378_s16, %s1779_s0 }
 0x2ba   : > { %p1380_p8 = pnand %p1379_p2, %p1866_p13 }
 0x2bb   : > { %p1385_p12 = por %p1384_p9, %p1383_p0 }
 0x2bc   : > { %p1381_p11 = pneg %p1380_p8 }
 0x2bd   : > { %p1387_p6 = por %p1386_p1, %p1385_p12 }
 0x2bf   : > { %p1388_p10 = pnand %p1387_p6, %p1381_p11 }
 0x2c1   : > { %1391 = shalt.err (!%p1388_p10)
}
 0x2c2   : > { %1180 = dma.vmem_to_hbm [thread:$0]  (%p1866_p13), %s1781_s18, 64, %s1779_s0, %s856_s29  }
 0x2c3 PF: > { %s881_s26 = sand.u32 1, %s1430_s27   ;;  %p1867_p4 = scmp.ne.s32.totalorder %s1846_s12, 0 }
 0x2c4   : > { %p1868_p5 = scmp.ge.s32.totalorder %s1442_s30, 2  ;;  %s882_s14 = scalar_lea.sflag [#allocation4], %s881_s26 }
 0x2c6   : > { %p1197_p3 = pnand %p1868_p5, %p1867_p4 }
 0x2c8   : > { %1425 = dma.done.wait (!%p1197_p3), %s882_s14, 64  }
 0x2c9   : > { %1427 = vsyncadd (!%p1197_p3), %s882_s14, 4294967232  ;;  %s1869_s30 = sld [smem:[#allocation17_spill]]  ;;  %s1870_s23 = sld [smem:[#allocation16_spill]] }
 0x2ca   : > { %s1871_s29 = sld [smem:[#allocation18_spill]]  ;;  %s1872_s27 = smov %s1434_s28 }
 0x2cf   : > { %p25_p7 = scmp.ge.s32.totalorder %s1869_s30, 4   ;;  %s1873_s28 = smov %s1870_s23 }
 0x2d1   :  { %27 = sbr.rel (!%p25_p7) target bundleno = 12 (0xc), region = 118 }
 0x2d8   :  { %887 = vsyncpa [#allocation3], 1 }
 0x2d9   :  { %889 = vsyncpa [#allocation3 + $0x1], 1 }
 0x2da   :  { %890 = vsyncpa [#allocation6], 1 }
 0x2db   :  { %892 = vsyncpa [#allocation6 + $0x1], 1 }
 0x2dc   :  { %893 = vsyncpa [#allocation9], 1 }
 0x2dd   :  { %894 = vsyncpa [#allocation4], 1 }
 0x2de   :  { %896 = vsyncpa [#allocation4 + $0x1], 1 }

</bundles_post_ra>
